<compile_context>
chip_gen: v7x
topology: tpu7x:2x2x1
jax: 0.10.0
libtpu: 0.0.40
codegen_flags: <defaults>
</compile_context>

<pallas_src>
import functools

import jax
import jax.numpy as jnp
from jax.experimental import pallas as pl
from jax.experimental.pallas import tpu as pltpu


def channel_attention_kernel(x_ref, w1t_ref, w2t_ref, o_ref,
                             sum_acc, max_acc, *, hw, thw, tb):
    # x_ref:   (TB, C, THW)      one tile of flattened activations (native dtype)
    # w1t_ref: (C, hidden_pad)   fc1.weight, squeezed, transposed, zero-padded
    # w2t_ref: (hidden_pad, C)   fc2.weight, squeezed, transposed, zero-padded
    # o_ref:   (TB, C)           per-batch channel softmax (written on last k)
    # sum_acc / max_acc: (TB, C) f32 running pooling accumulators
    k = pl.program_id(1)
    last_k = pl.num_programs(1) - 1

    @pl.when(k == 0)
    def _():
        sum_acc[...] = jnp.zeros(sum_acc.shape, sum_acc.dtype)
        max_acc[...] = jnp.full(max_acc.shape, -jnp.inf, max_acc.dtype)

    x = x_ref[...]                                   # (TB, C, THW), native dtype

    def accumulate(x_sum, x_max):
        # Sum in f32; max reduced in the native dtype (exact), cast once.
        sum_acc[...] += jnp.sum(x_sum.astype(jnp.float32), axis=-1)
        max_acc[...] = jnp.maximum(
            max_acc[...], jnp.max(x_max, axis=-1).astype(jnp.float32))

    if hw % thw != 0:
        # Only the single ragged tail tile pays for the mask.
        @pl.when(k < last_k)
        def _():
            accumulate(x, x)

        @pl.when(k == last_k)
        def _():
            col = jax.lax.broadcasted_iota(jnp.int32, x.shape, 2) + k * thw
            valid = col < hw
            x_sum = jnp.where(valid, x, jnp.zeros((), x.dtype))
            x_max = jnp.where(valid, x, jnp.full((), -jnp.inf, x.dtype))
            accumulate(x_sum, x_max)
    else:
        accumulate(x, x)

    @pl.when(k == last_k)
    def _():
        avg = sum_acc[...] * (1.0 / hw)                           # (TB, C)
        mx = max_acc[...]                                         # (TB, C)
        w1t = w1t_ref[...]                                        # (C, Hp) f32
        w2t = w2t_ref[...]                                        # (Hp, C) f32

        if tb % 8 == 0:
            # Fused: one MXU pass over the stacked (2*TB, C) pooled matrix.
            pooled = jnp.concatenate([avg, mx], axis=0)           # (2*TB, C)
            h = jnp.maximum(
                jnp.dot(pooled, w1t, preferred_element_type=jnp.float32), 0.0)
            out2 = jnp.dot(h, w2t, preferred_element_type=jnp.float32)
            out = out2[:tb] + out2[tb:]                           # (TB, C)
        else:
            # Small / unaligned TB: two passes (avoids sublane-unaligned concat).
            def mlp(v):
                h = jnp.maximum(
                    jnp.dot(v, w1t, preferred_element_type=jnp.float32), 0.0)
                return jnp.dot(h, w2t, preferred_element_type=jnp.float32)
            out = mlp(avg) + mlp(mx)                              # (TB, C)

        # Softmax over channels (dim=1 in the NCHW PyTorch tensor).  The divide
        # happens once per batch block, so use the exact reciprocal.
        out = out - jnp.max(out, axis=-1, keepdims=True)
        e = jnp.exp(out)
        denom = jnp.sum(e, axis=-1, keepdims=True)
        o_ref[...] = (e / denom).astype(o_ref.dtype)


def _choose_tiles(B, C, HW, itemsize, block_budget):
    """Pick (TB, THW) so one x block is around <= block_budget bytes."""
    # --- spatial tile ---
    if HW < 128 or 8 * C * HW * itemsize <= block_budget:
        thw = HW                                  # full spatial extent in one block
    else:
        max_thw = max(128, (block_budget // (8 * C * itemsize)) // 128 * 128)
        max_thw = min(max_thw, (HW // 128) * 128)
        if HW % 128 == 0:
            # Largest divisor of HW that is a multiple of 128 and fits the
            # budget -> hw % thw == 0, the masked tail path vanishes.
            thw = 128
            d = 128
            while d <= max_thw:
                if HW % d == 0:
                    thw = d
                d += 128
        else:
            thw = max_thw

    # --- batch tile (sublane dim of the (TB, C) output: multiple of 8, or full B) ---
    if B < 8:
        tb = B                                    # full-extent batch block
    else:
        tb = block_budget // max(1, C * thw * itemsize)
        tb = (tb // 8) * 8
        tb = max(8, min(tb, 256, (B // 8) * 8))
        if B >= 16:
            # Keep >= 2 "parallel" batch grid steps so both v7x TCs get work.
            half = ((-(-B // 2) + 7) // 8) * 8
            tb = min(tb, half)
    return tb, thw


def channel_attention(x, w1, w2, *, block_budget=12 * 1024 * 1024):
    """x:  (B, C, H, W) activations (f32 or bf16; passed to the kernel untouched).
    w1: (hidden, C, 1, 1)  -- fc1.weight (no bias), hidden = C // 16
    w2: (C, hidden, 1, 1)  -- fc2.weight (no bias)
    Returns (B, C, 1, 1) softmax-over-channels attention, matching PyTorch."""
    B, C, H, W = x.shape
    hidden = w1.shape[0]
    HW = H * W
    itemsize = jnp.dtype(x.dtype).itemsize

    tb, thw = _choose_tiles(B, C, HW, itemsize, block_budget)
    hidden_pad = ((hidden + 127) // 128) * 128      # full 128-lane MXU tile

    x_flat = x.reshape(B, C, HW)                    # no batch padding / extra HBM pass

    # Zero-padded, pre-transposed 1x1-conv weights (ReLU(0)=0 and zero rows of
    # w2 contribute nothing, so padding is exact).
    w1t = jnp.zeros((C, hidden_pad), jnp.float32).at[:, :hidden].set(
        w1.reshape(hidden, C).astype(jnp.float32).T)
    w2t = jnp.zeros((hidden_pad, C), jnp.float32).at[:hidden, :].set(
        w2.reshape(C, hidden).astype(jnp.float32).T)

    n_b = pl.cdiv(B, tb)
    n_k = pl.cdiv(HW, thw)

    kernel = functools.partial(channel_attention_kernel, hw=HW, thw=thw, tb=tb)

    out = pl.pallas_call(
        kernel,
        out_shape=jax.ShapeDtypeStruct((B, C), x.dtype),
        grid_spec=pltpu.PrefetchScalarGridSpec(
            num_scalar_prefetch=0,
            grid=(n_b, n_k),                        # spatial reduction axis last
            in_specs=[
                pl.BlockSpec((tb, C, thw), lambda b, k: (b, 0, k)),
                pl.BlockSpec((C, hidden_pad), lambda b, k: (0, 0)),
                pl.BlockSpec((hidden_pad, C), lambda b, k: (0, 0)),
            ],
            out_specs=pl.BlockSpec((tb, C), lambda b, k: (b, 0)),
            scratch_shapes=[
                pltpu.VMEM((tb, C), jnp.float32),   # running sum
                pltpu.VMEM((tb, C), jnp.float32),   # running max
            ],
        ),
        compiler_params=pltpu.CompilerParams(
            dimension_semantics=("parallel", "arbitrary"),
            vmem_limit_bytes=48 * 1024 * 1024),
    )(x_flat, w1t, w2t)

    return out.reshape(B, C, 1, 1)


def channel_attention_ref(x, w1, w2):
    """Pure-JAX reference mirroring the PyTorch forward."""
    B, C, H, W = x.shape
    hidden = w1.shape[0]
    w1m = w1.reshape(hidden, C).astype(jnp.float32)
    w2m = w2.reshape(C, hidden).astype(jnp.float32)

    def mlp(v):  # v: (B, C)
        h = jnp.maximum(v @ w1m.T, 0.0)
        return h @ w2m.T

    xf = x.astype(jnp.float32)
    avg = jnp.mean(xf, axis=(2, 3))
    mx = jnp.max(xf, axis=(2, 3))
    out = mlp(avg) + mlp(mx)                    # (B, C)
    sm = jax.nn.softmax(out, axis=1)
    return sm.reshape(B, C, 1, 1).astype(x.dtype)


if __name__ == "__main__":
    def run_case(B, C, H, W, block_budget=None, seed=0):
        hidden = max(C // 16, 1)
        key = jax.random.PRNGKey(seed)
        kx, k1, k2 = jax.random.split(key, 3)
        x = jax.random.normal(kx, (B, C, H, W), dtype=jnp.float32)
        w1 = jax.random.normal(k1, (hidden, C, 1, 1), jnp.float32) * (1.0 / C) ** 0.5
        w2 = jax.random.normal(k2, (C, hidden, 1, 1), jnp.float32) * (1.0 / hidden) ** 0.5
        kwargs = {} if block_budget is None else {"block_budget": block_budget}
        out = jax.block_until_ready(channel_attention(x, w1, w2, **kwargs))
        ref = channel_attention_ref(x, w1, w2)
        assert out.shape == (B, C, 1, 1)
        assert jnp.allclose(out, ref, atol=2e-3, rtol=2e-2), (
            f"max abs err {jnp.max(jnp.abs(out - ref))}")

    # Small canonical case (in_planes must be >= 16 so hidden = C // 16 >= 1).
    run_case(2, 32, 16, 16)
    # Ragged batch edge + ragged spatial tail + fused stacked-MLP path
    # (a tiny forced block budget exercises the tiled / masked code paths).
    run_case(9, 32, 20, 20, block_budget=256 * 1024, seed=1)

    print("KERNEL_OK")
</pallas_src>

<mosaic_0001>
module attributes {stable_mosaic.version = 11 : i64} {
  func.func @channel_attention_kernel(%arg0: i32, %arg1: i32, %arg2: memref<2x32x256xf32, #tpu.memory_space<vmem>>, %arg3: memref<32x128xf32, #tpu.memory_space<vmem>>, %arg4: memref<128x32xf32, #tpu.memory_space<vmem>>, %arg5: memref<2x32xf32, #tpu.memory_space<vmem>>, %arg6: memref<2x32xf32, #tpu.memory_space<vmem>>, %arg7: memref<2x32xf32, #tpu.memory_space<vmem>>) attributes {dimension_semantics = [#tpu.dimension_semantics<parallel>, #tpu.dimension_semantics<arbitrary>], iteration_bounds = array<i64: 1, 1>, scalar_prefetch = 0 : i64, scratch_operands = 2 : i64, tpu.core_type = #tpu.core_type<tc>, window_params = [{transform_indices = @transform_0, window_bounds = array<i64: 2, 32, 256>}, {pipeline_mode = #tpu.pipeline_mode<synchronous>, transform_indices = @transform_1, window_bounds = array<i64: 32, 128>}, {pipeline_mode = #tpu.pipeline_mode<synchronous>, transform_indices = @transform_2, window_bounds = array<i64: 128, 32>}, {transform_indices = @transform_3, window_bounds = array<i64: 2, 32>}]} {
    %c0_i32 = arith.constant 0 : i32
    %0 = arith.cmpi eq, %arg1, %c0_i32 : i32
    %1 = arith.extui %0 : i1 to i32
    %c0_i32_0 = arith.constant 0 : i32
    %2 = arith.cmpi ne, %1, %c0_i32_0 : i32
    scf.if %2 {
      %cst_14 = arith.constant 0.000000e+00 : f32
      %15 = vector.broadcast %cst_14 : f32 to vector<2x32xf32>
      %c0_15 = arith.constant 0 : index
      %c0_16 = arith.constant 0 : index
      %16 = vector.load %arg6[%c0_15, %c0_16] : memref<2x32xf32, #tpu.memory_space<vmem>>, vector<2x32xf32>
      tpu.vector_store %arg6[%c0_15, %c0_16], %15 {strides = array<i32>} : memref<2x32xf32, #tpu.memory_space<vmem>>, vector<2x32xf32>,
      %cst_17 = arith.constant 0xFF800000 : f32
      %17 = vector.broadcast %cst_17 : f32 to vector<2x32xf32>
      %c0_18 = arith.constant 0 : index
      %c0_19 = arith.constant 0 : index
      %18 = vector.load %arg7[%c0_18, %c0_19] : memref<2x32xf32, #tpu.memory_space<vmem>>, vector<2x32xf32>
      tpu.vector_store %arg7[%c0_18, %c0_19], %17 {strides = array<i32>} : memref<2x32xf32, #tpu.memory_space<vmem>>, vector<2x32xf32>,
    } else {
    }
    %c0 = arith.constant 0 : index
    %c0_1 = arith.constant 0 : index
    %c0_2 = arith.constant 0 : index
    %3 = vector.load %arg2[%c0, %c0_1, %c0_2] : memref<2x32x256xf32, #tpu.memory_space<vmem>>, vector<2x32x256xf32>
    %c0_3 = arith.constant 0 : index
    %c0_4 = arith.constant 0 : index
    %4 = vector.load %arg6[%c0_3, %c0_4] : memref<2x32xf32, #tpu.memory_space<vmem>>, vector<2x32xf32>
    %cst = arith.constant dense<0.000000e+00> : vector<2x32xf32>
    %5 = vector.multi_reduction <add>, %3, %cst [2] : vector<2x32x256xf32> to vector<2x32xf32>
    %6 = arith.addf %4, %5 : vector<2x32xf32>
    %c0_5 = arith.constant 0 : index
    %c0_6 = arith.constant 0 : index
    %7 = vector.load %arg6[%c0_5, %c0_6] : memref<2x32xf32, #tpu.memory_space<vmem>>, vector<2x32xf32>
    tpu.vector_store %arg6[%c0_5, %c0_6], %6 {strides = array<i32>} : memref<2x32xf32, #tpu.memory_space<vmem>>, vector<2x32xf32>,
    %c0_7 = arith.constant 0 : index
    %c0_8 = arith.constant 0 : index
    %8 = vector.load %arg7[%c0_7, %c0_8] : memref<2x32xf32, #tpu.memory_space<vmem>>, vector<2x32xf32>
    %cst_9 = arith.constant dense<0xFF800000> : vector<2x32xf32>
    %9 = vector.multi_reduction <maximumf>, %3, %cst_9 [2] : vector<2x32x256xf32> to vector<2x32xf32>
    %10 = arith.maximumf %8, %9 : vector<2x32xf32>
    %c0_10 = arith.constant 0 : index
    %c0_11 = arith.constant 0 : index
    %11 = vector.load %arg7[%c0_10, %c0_11] : memref<2x32xf32, #tpu.memory_space<vmem>>, vector<2x32xf32>
    tpu.vector_store %arg7[%c0_10, %c0_11], %10 {strides = array<i32>} : memref<2x32xf32, #tpu.memory_space<vmem>>, vector<2x32xf32>,
    %c0_i32_12 = arith.constant 0 : i32
    %12 = arith.cmpi eq, %arg1, %c0_i32_12 : i32
    %13 = arith.extui %12 : i1 to i32
    %c0_i32_13 = arith.constant 0 : i32
    %14 = arith.cmpi ne, %13, %c0_i32_13 : i32
    scf.if %14 {
      %c0_14 = arith.constant 0 : index
      %c0_15 = arith.constant 0 : index
      %15 = vector.load %arg6[%c0_14, %c0_15] : memref<2x32xf32, #tpu.memory_space<vmem>>, vector<2x32xf32>
      %cst_16 = arith.constant 3.906250e-03 : f32
      %16 = vector.broadcast %cst_16 : f32 to vector<2x32xf32>
      %17 = arith.mulf %15, %16 : vector<2x32xf32>
      %c0_17 = arith.constant 0 : index
      %c0_18 = arith.constant 0 : index
      %18 = vector.load %arg7[%c0_17, %c0_18] : memref<2x32xf32, #tpu.memory_space<vmem>>, vector<2x32xf32>
      %c0_19 = arith.constant 0 : index
      %c0_20 = arith.constant 0 : index
      %19 = vector.load %arg3[%c0_19, %c0_20] : memref<32x128xf32, #tpu.memory_space<vmem>>, vector<32x128xf32>
      %c0_21 = arith.constant 0 : index
      %c0_22 = arith.constant 0 : index
      %20 = vector.load %arg4[%c0_21, %c0_22] : memref<128x32xf32, #tpu.memory_space<vmem>>, vector<128x32xf32>
      %cst_23 = arith.constant dense<0.000000e+00> : vector<2x128xf32>
      %21 = tpu.matmul %17, %19, %cst_23 {dimension_numbers = #tpu.dot_dimension_numbers<[1], [0], [0], [1], [0, 0, 1, 1], [], []>} : vector<2x32xf32>, vector<32x128xf32>, vector<2x128xf32> -> vector<2x128xf32>
      %cst_24 = arith.constant 0.000000e+00 : f32
      %22 = vector.broadcast %cst_24 : f32 to vector<2x128xf32>
      %23 = arith.maximumf %21, %22 : vector<2x128xf32>
      %cst_25 = arith.constant dense<0.000000e+00> : vector<2x32xf32>
      %24 = tpu.matmul %23, %20, %cst_25 {dimension_numbers = #tpu.dot_dimension_numbers<[1], [0], [0], [1], [0, 0, 1, 1], [], []>} : vector<2x128xf32>, vector<128x32xf32>, vector<2x32xf32> -> vector<2x32xf32>
      %cst_26 = arith.constant dense<0.000000e+00> : vector<2x128xf32>
      %25 = tpu.matmul %18, %19, %cst_26 {dimension_numbers = #tpu.dot_dimension_numbers<[1], [0], [0], [1], [0, 0, 1, 1], [], []>} : vector<2x32xf32>, vector<32x128xf32>, vector<2x128xf32> -> vector<2x128xf32>
      %cst_27 = arith.constant 0.000000e+00 : f32
      %26 = vector.broadcast %cst_27 : f32 to vector<2x128xf32>
      %27 = arith.maximumf %25, %26 : vector<2x128xf32>
      %cst_28 = arith.constant dense<0.000000e+00> : vector<2x32xf32>
      %28 = tpu.matmul %27, %20, %cst_28 {dimension_numbers = #tpu.dot_dimension_numbers<[1], [0], [0], [1], [0, 0, 1, 1], [], []>} : vector<2x128xf32>, vector<128x32xf32>, vector<2x32xf32> -> vector<2x32xf32>
      %29 = arith.addf %24, %28 : vector<2x32xf32>
      %cst_29 = arith.constant dense<0xFF800000> : vector<2xf32>
      %30 = vector.multi_reduction <maximumf>, %29, %cst_29 [1] : vector<2x32xf32> to vector<2xf32>
      %31 = vector.shape_cast %30 : vector<2xf32> to vector<2x1xf32>
      %32 = vector.broadcast %31 : vector<2x1xf32> to vector<2x32xf32>
      %33 = arith.subf %29, %32 : vector<2x32xf32>
      %34 = math.exp %33 : vector<2x32xf32>
      %cst_30 = arith.constant dense<0.000000e+00> : vector<2xf32>
      %35 = vector.multi_reduction <add>, %34, %cst_30 [1] : vector<2x32xf32> to vector<2xf32>
      %36 = vector.shape_cast %35 : vector<2xf32> to vector<2x1xf32>
      %37 = vector.broadcast %36 : vector<2x1xf32> to vector<2x32xf32>
      %38 = arith.divf %34, %37 : vector<2x32xf32>
      %c0_31 = arith.constant 0 : index
      %c0_32 = arith.constant 0 : index
      %39 = vector.load %arg5[%c0_31, %c0_32] : memref<2x32xf32, #tpu.memory_space<vmem>>, vector<2x32xf32>
      tpu.vector_store %arg5[%c0_31, %c0_32], %38 {strides = array<i32>} : memref<2x32xf32, #tpu.memory_space<vmem>>, vector<2x32xf32>,
    } else {
    }
    return
  }
  func.func @transform_0(%arg0: i32, %arg1: i32) -> (i32, i32, i32) {
    %c0_i32 = arith.constant 0 : i32
    %c0_i32_0 = arith.constant 0 : i32
    return %arg0, %c0_i32, %arg1 : i32, i32, i32
  }
  func.func @transform_1(%arg0: i32, %arg1: i32) -> (i32, i32) {
    %c0_i32 = arith.constant 0 : i32
    %c0_i32_0 = arith.constant 0 : i32
    %c0_i32_1 = arith.constant 0 : i32
    return %c0_i32, %c0_i32_0 : i32, i32
  }
  func.func @transform_2(%arg0: i32, %arg1: i32) -> (i32, i32) {
    %c0_i32 = arith.constant 0 : i32
    %c0_i32_0 = arith.constant 0 : i32
    %c0_i32_1 = arith.constant 0 : i32
    return %c0_i32, %c0_i32_0 : i32, i32
  }
  func.func @transform_3(%arg0: i32, %arg1: i32) -> (i32, i32) {
    %c0_i32 = arith.constant 0 : i32
    %c0_i32_0 = arith.constant 0 : i32
    return %arg0, %c0_i32 : i32, i32
  }
}

</mosaic_0001>

<bundles_post_ra>
// kernel: tpu_custom_call.1
= control target key start
LH: loop header
LB: loop body
LE: loop exit
PB: predicated region body
PF: predicated region fallthrough
CT: control target
= control target key end

     0   :  { %s968_s0 = inlined_call_operand.vmem [shape: f32[2,32,256], index: 0, kind: input, shape index: {}]   ;;  %s969_s1 = inlined_call_operand.vmem [shape: f32[32,128], index: 1, kind: input, shape index: {}]   ;;  %s970_s2 = inlined_call_operand.vmem [shape: f32[128,32], index: 2, kind: input, shape index: {}]   ;;  %s971_s3 = inlined_call_operand.hbm [shape: f32[2,32], index: 3, kind: output, shape index: {}]  }
   0x1   :  { %v30_v0 = vld [vmem:[%s968_s0 + $0x40] sm:$0xff]  ;;  %v31_v1 = vld [vmem:[%s968_s0 + $0x48] sm:$0xff]  ;;  %v32_v5 = vld [vmem:[%s968_s0 + $0x50] sm:$0xff] }
   0x2   :  { %v22_v2 = vld [vmem:[%s968_s0] sm:$0xff]  ;;  %v51_v3 = vadd.f32 %v31_v1, %v30_v0  ;;  %v23_v4 = vld [vmem:[%s968_s0 + $0x8] sm:$0xff]  ;;  %v33_v6 = vld [vmem:[%s968_s0 + $0x58] sm:$0xff] }
   0x3   :  { %v39_v7 = vadd.f32 %v23_v4, %v22_v2  ;;  %v24_v8 = vld [vmem:[%s968_s0 + $0x10] sm:$0xff]  ;;  %v25_v9 = vld [vmem:[%s968_s0 + $0x18] sm:$0xff]  ;;  %v54_v10 = vadd.f32 %v33_v6, %v32_v5  ;;  %v34_v12 = vld [vmem:[%s968_s0 + $0x60] sm:$0xff] }
   0x4   :  { %52 = vadd.xlane.f32.xlu1 %v51_v3  ;;  %v42_v11 = vadd.f32 %v25_v9, %v24_v8  ;;  %v35_v13 = vld [vmem:[%s968_s0 + $0x68] sm:$0xff]  ;;  %v26_v14 = vld [vmem:[%s968_s0 + $0x20] sm:$0xff] }
   0x5   :  { %40 = vadd.xlane.f32.xlu0 %v39_v7  ;;  %v27_v15 = vld [vmem:[%s968_s0 + $0x28] sm:$0xff] }
   0x6   :  { %8 = vsyncpa [#allocation5], 0  ;;  %v57_v16 = vadd.f32 %v35_v13, %v34_v12  ;;  %v45_v17 = vadd.f32 %v27_v15, %v26_v14  ;;  %v36_v18 = vld [vmem:[%s968_s0 + $0x70] sm:$0xff]  ;;  %v37_v19 = vld [vmem:[%s968_s0 + $0x78] sm:$0xff]  ;;  %v127_v24 = vmax.f32 %v24_v8, %v25_v9  ;;  %v124_v25 = vmax.f32 %v22_v2, %v23_v4 }
   0x7   :  { %v28_v20 = vld [vmem:[%s968_s0 + $0x30] sm:$0xff]  ;;  %v29_v21 = vld [vmem:[%s968_s0 + $0x38] sm:$0xff]  ;;  %v60_v22 = vadd.f32 %v37_v19, %v36_v18  ;;  %v139_v26 = vmax.f32 %v32_v5, %v33_v6  ;;  %v136_v27 = vmax.f32 %v30_v0, %v31_v1  ;;  %v142_v28 = vmax.f32 %v34_v12, %v35_v13  ;;  %v204_v33 = vld [vmem:[%s969_s1] sm:$0xff] }
   0x8   :  { %55 = vadd.xlane.f32.xlu1 %v54_v10  ;;  %v48_v23 = vadd.f32 %v29_v21, %v28_v20  ;;  %v130_v29 = vmax.f32 %v26_v14, %v27_v15  ;;  %vm19_vm0 = vcmask 254976   ;;  %v771_v30 = vmov 0.0   ;;  %v205_v34 = vld [vmem:[%s969_s1 + $0x8] sm:$0xff]  ;;  %v206_v37 = vld [vmem:[%s969_s1 + $0x10] sm:$0xff]  ;;  %v207_v38 = vld [vmem:[%s969_s1 + $0x18] sm:$0xff] }
   0x9   :  { %43 = vadd.xlane.f32.xlu0 %v42_v11  ;;  %20 = vst.msk [vmem:[#allocation2] sm:$0x3] %vm19_vm0, %v771_v30  ;;  %v145_v31 = vmax.f32 %v36_v18, %v37_v19  ;;  %v133_v32 = vmax.f32 %v28_v20, %v29_v21  ;;  %v678_v35 = vpack.c.bf16 %v205_v34, %v204_v33  ;;  %v772_v36 = vmov 0.0|0.0   ;;  %v209_v18 = vld [vmem:[%s970_s2 + $0x8] sm:$0xff] }
   0xa   :  { %677 = vmatprep.subr.bf16.mxu0 %v772_v36  ;;  %683 = vmatprep.subr.bf16.mxu1 %v772_v36  ;;  %v681_v39 = vpack.c.bf16 %v207_v38, %v206_v37  ;;  %v773_v40 = vmov -inf   ;;  %vm774_vm1 = vmmov 0   ;;  %v71_v41 = vlaneseq }
   0xb   :  { %679 = vmatpush3.bf16.msra.mxu0 %v678_v35  ;;  %685 = vmatpush3.bf16.msra.mxu1 %v678_v35  ;;  %21 = vst.msk [vmem:[#allocation3] sm:$0x3] %vm19_vm0, %v773_v40  ;;  %vm82_vm2 = vcmask 130112   ;;  %vm89_vm3 = vcmask 195712   ;;  %vm96_vm4 = vcmask 261312   ;;  %vm117_vm5 = vcmask 1041409  }
   0xc   :  { %58 = vadd.xlane.f32.xlu1 %v57_v16  ;;  %680 = vmatprep.subr.bf16.mxu0 %v772_v36  ;;  %v72_v42 = vand.u32 127, %v71_v41  ;;  %v74_v47 = vshrl.u32 %v71_v41, 7  ;;  %vm224_vm6 = vcmask 261120  }
   0xd   :  { %46 = vadd.xlane.f32.xlu0 %v45_v17  ;;  %686 = vmatprep.subr.bf16.mxu1 %v772_v36  ;;  %v208_v17 = vld [vmem:[%s970_s2] sm:$0xff] }
   0xe   :  { %593 = vmatprep.mubr.msk.f32.mxu0 %vm774_vm1, %v771_v30  ;;  %604 = vmatprep.mubr.msk.f32.mxu1 %vm774_vm1, %v771_v30  ;;  %v77_v45 = vadd.s32 4294967288, %v72_v42  ;;  %v84_v46 = vadd.s32 4294967280, %v72_v42  ;;  %v91_v51 = vadd.s32 4294967272, %v72_v42  ;;  %v75_v53 = vsub.s32 %v72_v42, %v74_v47 }
   0xf   :  { %682 = vmatpush3.bf16.msra.mxu0 %v681_v39  ;;  %688 = vmatpush3.bf16.msra.mxu1 %v681_v39 }
  0x10   :  { %61 = vadd.xlane.f32.xlu1 %v60_v22  ;;  %713 = vmatprep.subr.bf16.mxu0 %v772_v36  ;;  %v80_v49 = vsub.s32 %v77_v45, %v74_v47  ;;  %v87_v52 = vsub.s32 %v84_v46, %v74_v47  ;;  %v94_v57 = vsub.s32 %v91_v51, %v74_v47  ;;  %v38_v8 = vld [vmem:[#allocation2] sm:$0x3]  ;;  %v213_v46 = vld [vmem:[%s970_s2 + $0x28] sm:$0xff]  ;;  %v215_v51 = vld [vmem:[%s970_s2 + $0x38] sm:$0xff] }
  0x11   :  { %49 = vadd.xlane.f32.xlu0 %v48_v23  ;;  %689 = vmatprep.subr.bf16.mxu1 %v772_v36  ;;  %v212_v45 = vld [vmem:[%s970_s2 + $0x20] sm:$0xff] }
  0x12   :  { %v123_v42 = vld [vmem:[#allocation3] sm:$0x3] }
  0x14   :  { %128 = vmax.xlane.f32.xlu1 %v127_v24 }
  0x15   :  { %125 = vmax.xlane.f32.xlu0 %v124_v25 }
  0x18   :  { %140 = vmax.xlane.f32.xlu1 %v139_v26 }
  0x19   :  { %137 = vmax.xlane.f32.xlu0 %v136_v27  ;;  %v690_v27 = vpack.c.bf16 %v209_v18, %v208_v17 }
  0x1c   :  { %143 = vmax.xlane.f32.xlu1 %v142_v28 }
  0x1d   :  { %131 = vmax.xlane.f32.xlu0 %v130_v29 }
  0x20   :  { %146 = vmax.xlane.f32.xlu1 %v145_v31  ;;  %v210_v31 = vld [vmem:[%s970_s2 + $0x10] sm:$0xff] }
  0x21   :  { %134 = vmax.xlane.f32.xlu0 %v133_v32  ;;  %v211_v32 = vld [vmem:[%s970_s2 + $0x18] sm:$0xff] }
  0x91   :  { %v53_v43 = vpop.xlane.xlu1 %52 }
  0x92   :  { %v41_v44 = vpop.xlane.xlu0 %40  ;;  %v101_v60 = vrot.slane %v53_v43, %v75_v53  ;;  %v693_v43 = vpack.c.bf16 %v211_v32, %v210_v31 }
  0x93   :  { %v76_v62 = vrot.slane %v41_v44, %v75_v53 }
  0x95   :  { %v56_v48 = vpop.xlane.xlu1 %55 }
  0x96   :  { %v44_v50 = vpop.xlane.xlu0 %43  ;;  %v105_v55 = vrot.slane %v56_v48, %v80_v49 }
  0x97   :  { %v81_v58 = vrot.slane %v44_v50, %v80_v49  ;;  %v214_v50 = vld [vmem:[%s970_s2 + $0x30] sm:$0xff] }
  0x98   :  { %v106_v0 = vsel %vm82_vm2, %v105_v55, %v101_v60  ;;  %v220_v60 = vld [vmem:[%s970_s2 + $0x60] sm:$0xff] }
  0x99   :  { %v59_v54 = vpop.xlane.xlu1 %58  ;;  %v83_v3 = vsel %vm82_vm2, %v81_v58, %v76_v62  ;;  %v219_v58 = vld [vmem:[%s970_s2 + $0x58] sm:$0xff] }
  0x9a   :  { %v47_v56 = vpop.xlane.xlu0 %46  ;;  %v110_v59 = vrot.slane %v59_v54, %v87_v52  ;;  %v217_v54 = vld [vmem:[%s970_s2 + $0x48] sm:$0xff] }
  0x9b   :  { %v88_v61 = vrot.slane %v47_v56, %v87_v52 }
  0x9c   :  { %v111_v4 = vsel %vm89_vm3, %v110_v59, %v106_v0 }
  0x9d   :  { %v62_v63 = vpop.xlane.xlu1 %61  ;;  %v90_v6 = vsel %vm89_vm3, %v88_v61, %v83_v3  ;;  %v221_v61 = vld [vmem:[%s970_s2 + $0x68] sm:$0xff] }
  0x9e   :  { %v115_v1 = vrot.slane %v62_v63, %v94_v57  ;;  %v50_v2 = vpop.xlane.xlu0 %49  ;;  %v708_v62 = vpack.c.bf16 %v221_v61, %v220_v60  ;;  %v223_v63 = vld [vmem:[%s970_s2 + $0x78] sm:$0xff] }
  0x9f   :  { %v95_v5 = vrot.slane %v50_v2, %v94_v57 }
  0xa0   :  { %v116_v7 = vsel %vm96_vm4, %v115_v1, %v111_v4 }
  0xa1   :  { %v97_v9 = vsel %vm96_vm4, %v95_v5, %v90_v6  ;;  %v129_v10 = vpop.xlane.xlu1 %128 }
  0xa2   :  { %v118_v11 = vsel %vm117_vm5, %v116_v7, %v97_v9  ;;  %v126_v12 = vpop.xlane.xlu0 %125  ;;  %v163_v22 = vrot.slane %v129_v10, %v80_v49 }
  0xa3   :  { %v120_v13 = vadd.f32 %v118_v11, %v38_v8  ;;  %v159_v23 = vrot.slane %v126_v12, %v75_v53 }
  0xa5   :  { %v141_v14 = vpop.xlane.xlu1 %140  ;;  %122 = vst.msk [vmem:[#allocation2] sm:$0x3] %vm19_vm0, %v120_v13  ;;  %v164_v37 = vsel %vm82_vm2, %v163_v22, %v159_v23 }
  0xa6   :  { %v138_v15 = vpop.xlane.xlu0 %137  ;;  %v182_v19 = vrot.slane %v141_v14, %v80_v49  ;;  %v696_v49 = vpack.c.bf16 %v213_v46, %v212_v45 }
  0xa7   :  { %v178_v20 = vrot.slane %v138_v15, %v75_v53  ;;  %v216_v53 = vld [vmem:[%s970_s2 + $0x40] sm:$0xff] }
  0xa8   :  { %v702_v56 = vpack.c.bf16 %v217_v54, %v216_v53 }
  0xa9   :  { %v144_v16 = vpop.xlane.xlu1 %143  ;;  %v183_v33 = vsel %vm82_vm2, %v182_v19, %v178_v20 }
  0xaa   :  { %v132_v21 = vpop.xlane.xlu0 %131  ;;  %v187_v24 = vrot.slane %v144_v16, %v87_v52 }
  0xab   :  { %v168_v25 = vrot.slane %v132_v21, %v87_v52  ;;  %v699_v52 = vpack.c.bf16 %v215_v51, %v214_v50 }
  0xac   :  { %v201_v26 = vld [vmem:[#allocation2] sm:$0x3]  ;;  %v188_v38 = vsel %vm89_vm3, %v187_v24, %v183_v33 }
  0xad   :  { %v147_v28 = vpop.xlane.xlu1 %146  ;;  %v202_v29 = vmul.f32 0.00390625, %v201_v26  ;;  %v169_v40 = vsel %vm89_vm3, %v168_v25, %v164_v37 }
  0xae   :  { %v192_v34 = vrot.slane %v147_v28, %v94_v57  ;;  %v135_v35 = vpop.xlane.xlu0 %134 }
  0xaf   :  { %v173_v39 = vrot.slane %v135_v35, %v94_v57  ;;  %594 = vmatmul.mubr.msk.f32.vlgmr.msra.gmra.mrb[0].mxu0 %vm224_vm6, %v202_v29  ;;  %v218_v57 = vld [vmem:[%s970_s2 + $0x50] sm:$0xff] }
  0xb0   :  { %v193_v41 = vsel %vm96_vm4, %v192_v34, %v188_v38  ;;  %715 = vmatpush3.bf16.msra.mxu0 %v690_v27  ;;  %674 = vmatprep.mubr.msk.f32.mxu0 %vm774_vm1, %v771_v30  ;;  %v705_v59 = vpack.c.bf16 %v219_v58, %v218_v57 }
  0xb1   :  { %v174_v44 = vsel %vm96_vm4, %v173_v39, %v169_v40  ;;  %716 = vmatprep.subr.bf16.mxu0 %v772_v36 }
  0xb2   :  { %v194_v47 = vsel %vm117_vm5, %v193_v41, %v174_v44 }
  0xb3   :  { %v196_v48 = vmax.f32 %v123_v42, %v194_v47 }
  0xb4   :  { %718 = vmatpush3.bf16.msra.mxu0 %v693_v43 }
  0xb5   :  { %197 = vst.msk [vmem:[#allocation3] sm:$0x3] %vm19_vm0, %v196_v48  ;;  %719 = vmatprep.subr.bf16.mxu0 %v772_v36 }
  0xb8   :  { %721 = vmatpush3.bf16.msra.mxu0 %v696_v49 }
  0xb9   :  { %722 = vmatprep.subr.bf16.mxu0 %v772_v36 }
  0xbc   :  { %v203_v55 = vld [vmem:[#allocation3] sm:$0x3]  ;;  %724 = vmatpush3.bf16.msra.mxu0 %v699_v52 }
  0xbd   :  { %605 = vmatmul.mubr.msk.f32.vlgmr.msra.gmra.mrb[0].mxu1 %vm224_vm6, %v203_v55  ;;  %725 = vmatprep.subr.bf16.mxu0 %v772_v36 }
  0xbe   :  { %691 = vmatpush3.bf16.msra.mxu1 %v690_v27  ;;  %639 = vmatprep.mubr.msk.f32.mxu1 %vm774_vm1, %v771_v30  ;;  %v222_v30 = vld [vmem:[%s970_s2 + $0x70] sm:$0xff]  ;;  %s775_s2 = smov [#allocation4]  }
  0xbf   :  { %692 = vmatprep.subr.bf16.mxu1 %v772_v36  ;;  %v711_v0 = vpack.c.bf16 %v223_v63, %v222_v30  ;;  %s531_s26 = sshll.u32 %s775_s2, 4  ;;  %s532_s26 = int_to_ptr.vmem [resolvable:$true] %s531_s26 }
  0xc0   :  { %727 = vmatpush3.bf16.msra.mxu0 %v702_v56  ;;  %s747_s27 = scalar_lea.vmem %s532_s26, 32  ;;  %p752_p1 = scmp.lt.s32.totalorder %s532_s26, %s532_s26 }
  0xc1   :  { %728 = vmatprep.subr.bf16.mxu0 %v772_v36  ;;  %p748_p0 = scmp.ne.s32.totalorder %s532_s26, %s747_s27  ;;  %p753_p2 = scmp.lt.s32.totalorder %s747_s27, %s747_s27 }
  0xc2   :  { %694 = vmatpush3.bf16.msra.mxu1 %v693_v43 }
  0xc3   :  { %695 = vmatprep.subr.bf16.mxu1 %v772_v36  ;;  %p754_p3 = por %p753_p2, %p752_p1 }
  0xc4   :  { %730 = vmatpush3.bf16.msra.mxu0 %v705_v59 }
  0xc5   :  { %731 = vmatprep.subr.bf16.mxu0 %v772_v36  ;;  %p755_p4 = pnand %p754_p3, %p748_p0 }
  0xc6   :  { %697 = vmatpush3.bf16.msra.mxu1 %v696_v49 }
  0xc7   :  { %698 = vmatprep.subr.bf16.mxu1 %v772_v36 }
  0xc8   :  { %733 = vmatpush3.bf16.msra.mxu0 %v708_v62 }
  0xc9   :  { %734 = vmatprep.subr.bf16.mxu0 %v772_v36 }
  0xca   :  { %700 = vmatpush3.bf16.msra.mxu1 %v699_v52 }
  0xcb   :  { %701 = vmatprep.subr.bf16.mxu1 %v772_v36 }
  0xcc   :  { %736 = vmatpush3.bf16.msra.mxu0 %v711_v0 }
  0xce   :  { %703 = vmatpush3.bf16.msra.mxu1 %v702_v56 }
  0xcf   :  { %704 = vmatprep.subr.bf16.mxu1 %v772_v36 }
  0xd2   :  { %706 = vmatpush3.bf16.msra.mxu1 %v705_v59 }
  0xd3   :  { %707 = vmatprep.subr.bf16.mxu1 %v772_v36 }
  0xd6   :  { %709 = vmatpush3.bf16.msra.mxu1 %v708_v62 }
  0xd7   :  { %710 = vmatprep.subr.bf16.mxu1 %v772_v36 }
  0xda   :  { %712 = vmatpush3.bf16.msra.mxu1 %v711_v0 }
 0x182   :  { %v294_v1 = vpop.f32.mrb[0].mxu0 }
 0x183   :  { %v298_v2 = vmax.f32 %v294_v1, 0.0  ;;  %v595_v3 = vpop.f32.mrb[1].mxu0 }
 0x185   :  { %675 = vmatmul.mubr.f32.vlgmr.msra.gmra.mrb[2].mxu0 %v298_v2 }
 0x190   :  { %v368_v4 = vpop.f32.mrb[0].mxu1 }
 0x191   :  { %v372_v5 = vmax.f32 %v368_v4, 0.0  ;;  %v606_v6 = vpop.f32.mrb[1].mxu1 }
 0x193   :  { %640 = vmatmul.mubr.f32.vlgmr.msra.gmra.mrb[2].mxu1 %v372_v5 }
 0x258   :  { %v509_v36 = vpop.f32.mrb[2].mxu0 }
 0x259   :  { %v676_v7 = vpop.f32.mrb[3].mxu0 }
 0x266   :  { %v439_v8 = vpop.f32.mrb[2].mxu1 }
 0x267   :  { %v510_v9 = vadd.f32 %v509_v36, %v439_v8  ;;  %v641_v10 = vpop.f32.mrb[3].mxu1 }
 0x269   :  { %v513_v11 = vsel %vm19_vm0, %v510_v9, -inf }
 0x26a   :  { %514 = vmax.xlane.f32.xlu0 %v513_v11 }
 0x2f7   :  { %v515_v12 = vpop.xlane.xlu0 %514 }
 0x2f8   :  { %v516_v13 = vsub.f32 %v510_v9, %v515_v12 }
 0x2fa   :  { %v517_v14 = vmul.f32 1.442695, %v516_v13 }
 0x2fc   :  { %743 = vpow2.f32 %v517_v14 }
 0x306   :  { %v744_v15 = vpop.eup %743 }
 0x307   :  { %v519_v16 = vsel %vm19_vm0, %v744_v15, 0.0 }
 0x308   :  { %520 = vadd.xlane.f32.xlu1 %v519_v16 }
 0x395   :  { %v521_v17 = vpop.xlane.xlu1 %520 }
 0x396   :  { %745 = vrcp.f32 %v521_v17 }
 0x3a0   :  { %v746_v18 = vpop.eup %745 }
 0x3a1   :  { %v523_v19 = vmul.f32 %v746_v18, %v744_v15 }
 0x3a3   :  { %524 = vst.msk [vmem:[#allocation4] sm:$0x3] %vm19_vm0, %v523_v19 }
 0x3a4   :  { %758 = shalt.err (!%p755_p4)
}
 0x3a5   :  { %s759_s30 = scalar_lea.hbm %s971_s3, 32 }
 0x3a6   :  { %p760_p5 = scmp.ne.s32.totalorder %s971_s3, %s759_s30  ;;  %p763_p6 = scmp.lt.u32.totalorder %s759_s30, %s971_s3 }
 0x3a8   :  { %p765_p7 = pnand %p763_p6, %p760_p5 }
 0x3aa   :  { %768 = shalt.err (!%p765_p7)
}
 0x3ab   :  { %534 = dma.vmem_to_hbm [thread:$0]  %s532_s26, 32, %s971_s3, [#allocation5]  }
 0x3ac   :  { %769 = dma.done.wait [#allocation5], 32  }
 0x3ad   :  { %770 = vsyncadd [#allocation5], 4294967264 }
 0x3ae   :  { %538 = vsyncpa [#allocation5], 1 }

</bundles_post_ra>
